<compile_context>
chip_gen: v7x
topology: tpu7x:2x2x1
jax: 0.10.0
libtpu: 0.0.40
codegen_flags: <defaults>
</compile_context>

<pallas_src>
import functools

import numpy as np
import jax
import jax.numpy as jnp
from jax import lax
from jax.experimental import pallas as pl
from jax.experimental.pallas import tpu as pltpu


# ---------------------------------------------------------------------------
# VMEM budgeting / tile selection
# ---------------------------------------------------------------------------
def _vmem_capacity_bytes():
    """Best-effort per-core VMEM capacity; conservative (v7x) fallback."""
    try:
        info = pltpu.get_tpu_info()
        for name in ("vmem_capacity_bytes", "vmem_size_bytes", "vmem_bytes"):
            v = getattr(info, name, None)
            if v:
                return int(v)
    except Exception:
        pass
    return 64 << 20  # conservative: works on every generation


def _vmem_budget_bytes():
    cap = _vmem_capacity_bytes()
    if cap <= (64 << 20):     # v7x: 64 MiB per TensorCore
        return 48 << 20
    return 96 << 20           # v5e / v6e: 128 MiB physical (scoped default is 16/32)


def _pick_tiles(B, HW, C, itemsize, budget_bytes):
    """Pick (TB rows, THW spatial chunk) from a VMEM budget.

    Per grid step the pipeline holds 2 arrays (src, tgt) x 2 buffers of
    [TB, THW, C] plus small feat/output blocks; we target ~2 MiB per input
    block and fill ~half the budget with the double-buffered stream.
    """
    target_blk = 2 << 20
    row_bytes = C * itemsize
    if HW * row_bytes <= target_blk or HW <= 8:
        thw = HW
    else:
        thw = max(8, min(HW, (target_blk // row_bytes) // 8 * 8))

    stream_budget = budget_bytes // 2
    per_row_blk = thw * row_bytes
    tb = int(stream_budget // (4 * per_row_blk))       # 2 arrays x 2 buffers
    align = 16 if itemsize <= 2 else 8                 # packed sublane tiles for bf16
    if tb >= B:
        tb = B
    elif tb >= align:
        tb = (tb // align) * align
    else:
        tb = min(align, B)
    # blocking rule: second-to-last block dims must be multiples of 8 or full.
    if tb != B and tb % 8 != 0:
        tb = min(B, max(8, (tb // 8) * 8))
    return tb, thw


# ---------------------------------------------------------------------------
# Kernel: spatial average pooling (channels-last) + per-row feature MSE
# ---------------------------------------------------------------------------
def _make_kernel(HW, THW, Df):
    inv_hw = np.float32(1.0 / HW)
    inv_df = np.float32(1.0 / Df)
    need_mask = (HW % THW) != 0

    def kernel(src_ref, tgt_ref, feat_ref, featp_ref, ps_ref, pt_ref, mf_ref):
        h = pl.program_id(1)                  # spatial-chunk (reduction) axis
        nh = pl.num_programs(1)

        # -- first spatial chunk for this batch block: init accumulators and
        #    compute the per-row feature MSE (symmetric, so the f_hq/f_lq row
        #    swap in the original code does not change its value).
        @pl.when(h == 0)
        def _init():
            ps_ref[...] = jnp.zeros_like(ps_ref)
            pt_ref[...] = jnp.zeros_like(pt_ref)
            f = feat_ref[...].astype(jnp.float32)
            fp = featp_ref[...].astype(jnp.float32)
            d = f - fp
            mf_ref[...] = jnp.sum(d * d, axis=-1, keepdims=True) * inv_df

        # -- accumulate spatial partial sums (channels on the lane axis).
        s = src_ref[...].astype(jnp.float32)  # [TB, THW, C]
        t = tgt_ref[...].astype(jnp.float32)
        if need_mask:                          # partial last spatial chunk
            C = s.shape[-1]
            pos = lax.broadcasted_iota(jnp.int32, (THW, C), 0) + h * THW
            keep = pos < HW                    # [THW, C] bool
            s = jnp.where(keep[None, :, :], s, 0.0)
            t = jnp.where(keep[None, :, :], t, 0.0)
        ps_ref[...] += jnp.sum(s, axis=1)      # [TB, C]
        pt_ref[...] += jnp.sum(t, axis=1)

        # -- last spatial chunk: turn sums into means (AdaptiveAvgPool2d(1)).
        @pl.when(h == nh - 1)
        def _fin():
            ps_ref[...] = ps_ref[...] * inv_hw
            pt_ref[...] = pt_ref[...] * inv_hw

    return kernel


# ---------------------------------------------------------------------------
# Wrapper: pallas_call streaming pass + exact qual-dependent epilogue in XLA
# ---------------------------------------------------------------------------
@functools.partial(jax.jit, static_argnames=("tb", "thw"))
def representation_loss(feat, feat_p, sources, targets, qual, tb=None, thw=None):
    """feat/feat_p: [B, ...]; sources/targets: [B, C, H, W]; qual: [B] in {0,1}."""
    B = sources.shape[0]
    C = sources.shape[1]
    HW = 1
    for d in sources.shape[2:]:
        HW *= d

    # Channels-last streaming layout (layout plumbing only): [B, HW, C].
    src = jnp.transpose(sources.reshape(B, C, HW), (0, 2, 1))
    tgt = jnp.transpose(targets.reshape(B, C, HW), (0, 2, 1))
    feat2 = feat.reshape(B, -1)
    featp2 = feat_p.reshape(B, -1)
    Df = feat2.shape[1]

    itemsize = jnp.dtype(sources.dtype).itemsize
    budget = _vmem_budget_bytes()
    tb_, thw_ = _pick_tiles(B, HW, C, itemsize, budget)
    if tb is not None:
        tb_ = max(1, min(int(tb), B))
    if thw is not None:
        thw_ = max(1, min(int(thw), HW))

    NB = pl.cdiv(B, tb_)
    NHW = pl.cdiv(HW, thw_)

    kernel = _make_kernel(HW, thw_, Df)
    ps, pt, mf = pl.pallas_call(
        kernel,
        out_shape=(
            jax.ShapeDtypeStruct((B, C), jnp.float32),   # pooled sources
            jax.ShapeDtypeStruct((B, C), jnp.float32),   # pooled targets
            jax.ShapeDtypeStruct((B, 1), jnp.float32),   # per-row MSE(feat, feat_p)
        ),
        grid=(NB, NHW),
        in_specs=[
            pl.BlockSpec((tb_, thw_, C), lambda i, h: (i, h, 0)),   # sources
            pl.BlockSpec((tb_, thw_, C), lambda i, h: (i, h, 0)),   # targets
            pl.BlockSpec((tb_, Df), lambda i, h: (i, 0)),           # feat
            pl.BlockSpec((tb_, Df), lambda i, h: (i, 0)),           # feat_p
        ],
        out_specs=(
            pl.BlockSpec((tb_, C), lambda i, h: (i, 0)),
            pl.BlockSpec((tb_, C), lambda i, h: (i, 0)),
            pl.BlockSpec((tb_, 1), lambda i, h: (i, 0)),
        ),
        compiler_params=pltpu.CompilerParams(
            # batch axis parallel (megacore on v7x); spatial reduction axis
            # last + arbitrary, with the outputs acting as resident accumulators.
            dimension_semantics=("parallel", "arbitrary"),
            vmem_limit_bytes=int(budget)),
    )(src, tgt, feat2, featp2)

    # ---- exact qual-dependent gather + weighted reduction (tiny, O(B*C)) ----
    # Encodes the original code's semantics, including `sources` being
    # reassigned BEFORE `targets` is built.
    q = qual.reshape(B).astype(jnp.int32)
    n1 = jnp.sum(q)
    cs1 = jnp.cumsum(q)
    cs0 = jnp.cumsum(1 - q)
    pos = jnp.where(q == 1, cs1 - 1, n1 + cs0 - 1)       # position after the cat's
    perm = jnp.zeros((B,), jnp.int32).at[pos].set(jnp.arange(B, dtype=jnp.int32))
    q_perm = q[perm]
    pp = perm[perm]
    q_pp = q[pp]

    pooled = jnp.concatenate([ps, pt], axis=0)            # [2B, C]: S rows, then T rows
    g_s = jnp.where(q_perm == 1, perm, B + perm)          # new_sources row gather
    g_t = jnp.where(q_perm == 1, B + perm,                # new_targets row gather
                    jnp.where(q_pp == 1, pp, B + pp))
    new_s = jnp.take(pooled, g_s, axis=0)                 # [B, C]
    new_t = jnp.take(pooled, g_t, axis=0)                 # [B, C]
    mse_st = jnp.mean((new_s - new_t) ** 2, axis=-1)      # [B]
    mf_perm = jnp.take(mf[:, 0], perm, axis=0)            # [B]
    return jnp.sum(mse_st * mf_perm)


# ---------------------------------------------------------------------------
# Literal float64 re-implementation of the PyTorch forward (reference)
# ---------------------------------------------------------------------------
def _np_reference(feat, feat_p, sources, targets, qual):
    feat = np.asarray(feat, np.float64).reshape(feat.shape[0], -1)
    feat_p = np.asarray(feat_p, np.float64).reshape(feat_p.shape[0], -1)
    S = np.asarray(sources, np.float64).reshape(
        sources.shape[0], sources.shape[1], -1).mean(-1)
    T = np.asarray(targets, np.float64).reshape(
        targets.shape[0], targets.shape[1], -1).mean(-1)
    qual = np.asarray(qual)
    m1, m0 = qual == 1, qual == 0
    f_hq = np.concatenate([feat[m1], feat_p[m0]], 0)
    f_lq = np.concatenate([feat_p[m1], feat[m0]], 0)
    S2 = np.concatenate([S[m1], T[m0]], 0)
    T2 = np.concatenate([T[m1], S2[m0]], 0)   # uses the NEW S2, as in the torch code
    loss = 0.0
    for i in range(len(S2)):
        loss += np.mean((S2[i] - T2[i]) ** 2) * np.mean((f_lq[i] - f_hq[i]) ** 2)
    return loss


if __name__ == "__main__":
    # --- test 1: typical small shapes (single batch block, single HW chunk) ---
    key = jax.random.PRNGKey(0)
    B, C, H, W, Df = 16, 256, 4, 4, 32
    ks = jax.random.split(key, 5)
    feat = jax.random.normal(ks[0], (B, Df), dtype=jnp.float32)
    feat_p = jax.random.normal(ks[1], (B, Df), dtype=jnp.float32)
    sources = jax.random.normal(ks[2], (B, C, H, W), dtype=jnp.float32)
    targets = jax.random.normal(ks[3], (B, C, H, W), dtype=jnp.float32)
    qual = jax.random.bernoulli(ks[4], 0.5, (B,)).astype(jnp.int32)

    loss = jax.block_until_ready(
        representation_loss(feat, feat_p, sources, targets, qual))
    ref = _np_reference(np.asarray(feat), np.asarray(feat_p),
                        np.asarray(sources), np.asarray(targets),
                        np.asarray(qual))
    assert np.allclose(float(loss), float(ref), rtol=1e-3, atol=1e-4), \
        (float(loss), float(ref))

    # --- test 2: irregular shapes exercising batch tiling, spatial chunking
    #             (with a masked partial last chunk) and output padding ---
    B2, C2, H2, W2, Df2 = 10, 128, 5, 5, 48
    ks2 = jax.random.split(jax.random.PRNGKey(1), 5)
    feat_b = jax.random.normal(ks2[0], (B2, Df2), dtype=jnp.float32)
    featp_b = jax.random.normal(ks2[1], (B2, Df2), dtype=jnp.float32)
    src_b = jax.random.normal(ks2[2], (B2, C2, H2, W2), dtype=jnp.float32)
    tgt_b = jax.random.normal(ks2[3], (B2, C2, H2, W2), dtype=jnp.float32)
    qual_b = jax.random.bernoulli(ks2[4], 0.5, (B2,)).astype(jnp.int32)

    loss2 = jax.block_until_ready(
        representation_loss(feat_b, featp_b, src_b, tgt_b, qual_b, tb=8, thw=8))
    ref2 = _np_reference(np.asarray(feat_b), np.asarray(featp_b),
                         np.asarray(src_b), np.asarray(tgt_b),
                         np.asarray(qual_b))
    assert np.allclose(float(loss2), float(ref2), rtol=1e-3, atol=1e-4), \
        (float(loss2), float(ref2))

    print("KERNEL_OK")
</pallas_src>

<mosaic_0001>
module attributes {stable_mosaic.version = 11 : i64} {
  func.func @kernel(%arg0: i32, %arg1: i32, %arg2: memref<16x16x256xf32, #tpu.memory_space<vmem>>, %arg3: memref<16x16x256xf32, #tpu.memory_space<vmem>>, %arg4: memref<16x32xf32, #tpu.memory_space<vmem>>, %arg5: memref<16x32xf32, #tpu.memory_space<vmem>>, %arg6: memref<16x256xf32, #tpu.memory_space<vmem>>, %arg7: memref<16x256xf32, #tpu.memory_space<vmem>>, %arg8: memref<16x1xf32, #tpu.memory_space<vmem>>) attributes {dimension_semantics = [#tpu.dimension_semantics<parallel>, #tpu.dimension_semantics<arbitrary>], iteration_bounds = array<i64: 1, 1>, scalar_prefetch = 0 : i64, scratch_operands = 0 : i64, tpu.core_type = #tpu.core_type<tc>, window_params = [{transform_indices = @transform_0, window_bounds = array<i64: 16, 16, 256>}, {transform_indices = @transform_1, window_bounds = array<i64: 16, 16, 256>}, {transform_indices = @transform_2, window_bounds = array<i64: 16, 32>}, {transform_indices = @transform_3, window_bounds = array<i64: 16, 32>}, {transform_indices = @transform_4, window_bounds = array<i64: 16, 256>}, {transform_indices = @transform_5, window_bounds = array<i64: 16, 256>}, {transform_indices = @transform_6, window_bounds = array<i64: 16, 1>}]} {
    %c0_i32 = arith.constant 0 : i32
    %0 = arith.cmpi eq, %arg1, %c0_i32 : i32
    %1 = arith.extui %0 : i1 to i32
    %c0_i32_0 = arith.constant 0 : i32
    %2 = arith.cmpi ne, %1, %c0_i32_0 : i32
    scf.if %2 {
      %cst_17 = arith.constant 0.000000e+00 : f32
      %16 = vector.broadcast %cst_17 : f32 to vector<16x256xf32>
      %c0_18 = arith.constant 0 : index
      %c0_19 = arith.constant 0 : index
      %17 = vector.load %arg6[%c0_18, %c0_19] : memref<16x256xf32, #tpu.memory_space<vmem>>, vector<16x256xf32>
      tpu.vector_store %arg6[%c0_18, %c0_19], %16 {strides = array<i32>} : memref<16x256xf32, #tpu.memory_space<vmem>>, vector<16x256xf32>,
      %cst_20 = arith.constant 0.000000e+00 : f32
      %18 = vector.broadcast %cst_20 : f32 to vector<16x256xf32>
      %c0_21 = arith.constant 0 : index
      %c0_22 = arith.constant 0 : index
      %19 = vector.load %arg7[%c0_21, %c0_22] : memref<16x256xf32, #tpu.memory_space<vmem>>, vector<16x256xf32>
      tpu.vector_store %arg7[%c0_21, %c0_22], %18 {strides = array<i32>} : memref<16x256xf32, #tpu.memory_space<vmem>>, vector<16x256xf32>,
      %c0_23 = arith.constant 0 : index
      %c0_24 = arith.constant 0 : index
      %20 = vector.load %arg4[%c0_23, %c0_24] : memref<16x32xf32, #tpu.memory_space<vmem>>, vector<16x32xf32>
      %c0_25 = arith.constant 0 : index
      %c0_26 = arith.constant 0 : index
      %21 = vector.load %arg5[%c0_25, %c0_26] : memref<16x32xf32, #tpu.memory_space<vmem>>, vector<16x32xf32>
      %22 = arith.subf %20, %21 : vector<16x32xf32>
      %23 = arith.mulf %22, %22 : vector<16x32xf32>
      %cst_27 = arith.constant dense<0.000000e+00> : vector<16xf32>
      %24 = vector.multi_reduction <add>, %23, %cst_27 [1] : vector<16x32xf32> to vector<16xf32>
      %25 = vector.shape_cast %24 : vector<16xf32> to vector<16x1xf32>
      %cst_28 = arith.constant 3.125000e-02 : f32
      %26 = vector.broadcast %cst_28 : f32 to vector<16x1xf32>
      %27 = arith.mulf %25, %26 : vector<16x1xf32>
      %c0_29 = arith.constant 0 : index
      %c0_30 = arith.constant 0 : index
      %28 = vector.load %arg8[%c0_29, %c0_30] : memref<16x1xf32, #tpu.memory_space<vmem>>, vector<16x1xf32>
      tpu.vector_store %arg8[%c0_29, %c0_30], %27 {strides = array<i32>} : memref<16x1xf32, #tpu.memory_space<vmem>>, vector<16x1xf32>,
    } else {
    }
    %c0 = arith.constant 0 : index
    %c0_1 = arith.constant 0 : index
    %c0_2 = arith.constant 0 : index
    %3 = vector.load %arg2[%c0, %c0_1, %c0_2] : memref<16x16x256xf32, #tpu.memory_space<vmem>>, vector<16x16x256xf32>
    %c0_3 = arith.constant 0 : index
    %c0_4 = arith.constant 0 : index
    %c0_5 = arith.constant 0 : index
    %4 = vector.load %arg3[%c0_3, %c0_4, %c0_5] : memref<16x16x256xf32, #tpu.memory_space<vmem>>, vector<16x16x256xf32>
    %c0_6 = arith.constant 0 : index
    %c0_7 = arith.constant 0 : index
    %5 = vector.load %arg6[%c0_6, %c0_7] : memref<16x256xf32, #tpu.memory_space<vmem>>, vector<16x256xf32>
    %cst = arith.constant dense<0.000000e+00> : vector<16x256xf32>
    %6 = vector.multi_reduction <add>, %3, %cst [1] : vector<16x16x256xf32> to vector<16x256xf32>
    %7 = arith.addf %5, %6 : vector<16x256xf32>
    %c0_8 = arith.constant 0 : index
    %c0_9 = arith.constant 0 : index
    %8 = vector.load %arg6[%c0_8, %c0_9] : memref<16x256xf32, #tpu.memory_space<vmem>>, vector<16x256xf32>
    tpu.vector_store %arg6[%c0_8, %c0_9], %7 {strides = array<i32>} : memref<16x256xf32, #tpu.memory_space<vmem>>, vector<16x256xf32>,
    %c0_10 = arith.constant 0 : index
    %c0_11 = arith.constant 0 : index
    %9 = vector.load %arg7[%c0_10, %c0_11] : memref<16x256xf32, #tpu.memory_space<vmem>>, vector<16x256xf32>
    %cst_12 = arith.constant dense<0.000000e+00> : vector<16x256xf32>
    %10 = vector.multi_reduction <add>, %4, %cst_12 [1] : vector<16x16x256xf32> to vector<16x256xf32>
    %11 = arith.addf %9, %10 : vector<16x256xf32>
    %c0_13 = arith.constant 0 : index
    %c0_14 = arith.constant 0 : index
    %12 = vector.load %arg7[%c0_13, %c0_14] : memref<16x256xf32, #tpu.memory_space<vmem>>, vector<16x256xf32>
    tpu.vector_store %arg7[%c0_13, %c0_14], %11 {strides = array<i32>} : memref<16x256xf32, #tpu.memory_space<vmem>>, vector<16x256xf32>,
    %c0_i32_15 = arith.constant 0 : i32
    %13 = arith.cmpi eq, %arg1, %c0_i32_15 : i32
    %14 = arith.extui %13 : i1 to i32
    %c0_i32_16 = arith.constant 0 : i32
    %15 = arith.cmpi ne, %14, %c0_i32_16 : i32
    scf.if %15 {
      %c0_17 = arith.constant 0 : index
      %c0_18 = arith.constant 0 : index
      %16 = vector.load %arg6[%c0_17, %c0_18] : memref<16x256xf32, #tpu.memory_space<vmem>>, vector<16x256xf32>
      %cst_19 = arith.constant 6.250000e-02 : f32
      %17 = vector.broadcast %cst_19 : f32 to vector<16x256xf32>
      %18 = arith.mulf %16, %17 : vector<16x256xf32>
      %c0_20 = arith.constant 0 : index
      %c0_21 = arith.constant 0 : index
      %19 = vector.load %arg6[%c0_20, %c0_21] : memref<16x256xf32, #tpu.memory_space<vmem>>, vector<16x256xf32>
      tpu.vector_store %arg6[%c0_20, %c0_21], %18 {strides = array<i32>} : memref<16x256xf32, #tpu.memory_space<vmem>>, vector<16x256xf32>,
      %c0_22 = arith.constant 0 : index
      %c0_23 = arith.constant 0 : index
      %20 = vector.load %arg7[%c0_22, %c0_23] : memref<16x256xf32, #tpu.memory_space<vmem>>, vector<16x256xf32>
      %cst_24 = arith.constant 6.250000e-02 : f32
      %21 = vector.broadcast %cst_24 : f32 to vector<16x256xf32>
      %22 = arith.mulf %20, %21 : vector<16x256xf32>
      %c0_25 = arith.constant 0 : index
      %c0_26 = arith.constant 0 : index
      %23 = vector.load %arg7[%c0_25, %c0_26] : memref<16x256xf32, #tpu.memory_space<vmem>>, vector<16x256xf32>
      tpu.vector_store %arg7[%c0_25, %c0_26], %22 {strides = array<i32>} : memref<16x256xf32, #tpu.memory_space<vmem>>, vector<16x256xf32>,
    } else {
    }
    return
  }
  func.func @transform_0(%arg0: i32, %arg1: i32) -> (i32, i32, i32) {
    %c0_i32 = arith.constant 0 : i32
    %c0_i32_0 = arith.constant 0 : i32
    return %arg0, %arg1, %c0_i32 : i32, i32, i32
  }
  func.func @transform_1(%arg0: i32, %arg1: i32) -> (i32, i32, i32) {
    %c0_i32 = arith.constant 0 : i32
    %c0_i32_0 = arith.constant 0 : i32
    return %arg0, %arg1, %c0_i32 : i32, i32, i32
  }
  func.func @transform_2(%arg0: i32, %arg1: i32) -> (i32, i32) {
    %c0_i32 = arith.constant 0 : i32
    %c0_i32_0 = arith.constant 0 : i32
    return %arg0, %c0_i32 : i32, i32
  }
  func.func @transform_3(%arg0: i32, %arg1: i32) -> (i32, i32) {
    %c0_i32 = arith.constant 0 : i32
    %c0_i32_0 = arith.constant 0 : i32
    return %arg0, %c0_i32 : i32, i32
  }
  func.func @transform_4(%arg0: i32, %arg1: i32) -> (i32, i32) {
    %c0_i32 = arith.constant 0 : i32
    %c0_i32_0 = arith.constant 0 : i32
    return %arg0, %c0_i32 : i32, i32
  }
  func.func @transform_5(%arg0: i32, %arg1: i32) -> (i32, i32) {
    %c0_i32 = arith.constant 0 : i32
    %c0_i32_0 = arith.constant 0 : i32
    return %arg0, %c0_i32 : i32, i32
  }
  func.func @transform_6(%arg0: i32, %arg1: i32) -> (i32, i32) {
    %c0_i32 = arith.constant 0 : i32
    %c0_i32_0 = arith.constant 0 : i32
    return %arg0, %c0_i32 : i32, i32
  }
}

</mosaic_0001>

<bundles_post_ra>
// kernel: representation_loss.1
= control target key start
LH: loop header
LB: loop body
LE: loop exit
PB: predicated region body
PF: predicated region fallthrough
CT: control target
= control target key end

     0   :  { %vm40_vm0 = vcmask 261120   ;;  %vm440_vm1 = vcmask 1041409   ;;  %vm442_vm2 = vcmask 1042434   ;;  %vm444_vm3 = vcmask 1043459   ;;  %s1502_s2 = inlined_call_operand.vmem [shape: f32[16,32], index: 2, kind: input, shape index: {}]   ;;  %s1503_s3 = inlined_call_operand.vmem [shape: f32[16,32], index: 3, kind: input, shape index: {}]   ;;  %s1504_s0 = inlined_call_operand.vmem [shape: f32[16,16,256], index: 0, kind: input, shape index: {}]   ;;  %s1505_s1 = inlined_call_operand.vmem [shape: f32[16,16,256], index: 1, kind: input, shape index: {}]   ;;  %s1506_s4 = inlined_call_operand.vmem [shape: f32[16,256], index: 4, kind: output, shape index: {0}]   ;;  %s1507_s5 = inlined_call_operand.vmem [shape: f32[16,256], index: 5, kind: output, shape index: {1}]   ;;  %s1508_s6 = inlined_call_operand.vmem [shape: f32[16,1], index: 6, kind: output, shape index: {2}]  }
   0x1   :  { %v32_v0 = vld [vmem:[%s1502_s2] sm:$0xff]  ;;  %v33_v2 = vld [vmem:[%s1502_s2 + $0x8] sm:$0xff]  ;;  %v54_v8 = vld [vmem:[%s1504_s0 + $0x10] sm:$0xff]  ;;  %vm446_vm4 = vcmask 1044484   ;;  %vm448_vm5 = vcmask 1045509   ;;  %vm450_vm6 = vcmask 1046534  }
   0x2   :  { %v34_v1 = vld [vmem:[%s1503_s3] sm:$0xff]  ;;  %v35_v4 = vld [vmem:[%s1503_s3 + $0x8] sm:$0xff]  ;;  %v55_v9 = vld [vmem:[%s1504_s0 + $0x18] sm:$0xff]  ;;  %vm452_vm7 = vcmask 1047559   ;;  %vm49_vm8 = vcmask 7168  }
   0x3   :  { %v36_v3 = vsub.f32 %v32_v0, %v34_v1  ;;  %v52_v5 = vld [vmem:[%s1504_s0] sm:$0xff]  ;;  %v53_v6 = vld [vmem:[%s1504_s0 + $0x8] sm:$0xff]  ;;  %v37_v7 = vsub.f32 %v33_v2, %v35_v4  ;;  %v58_v13 = vld [vmem:[%s1504_s0 + $0x30] sm:$0xff] }
   0x4   :  { %v56_v10 = vld [vmem:[%s1504_s0 + $0x20] sm:$0xff]  ;;  %v57_v12 = vld [vmem:[%s1504_s0 + $0x28] sm:$0xff]  ;;  %v59_v14 = vld [vmem:[%s1504_s0 + $0x38] sm:$0xff]  ;;  %v184_v15 = vadd.f32 %v54_v8, %v52_v5  ;;  %v191_v16 = vadd.f32 %v55_v9, %v53_v6 }
   0x5   :  { %v38_v11 = vmul.f32 %v36_v3, %v36_v3  ;;  %v39_v17 = vmul.f32 %v37_v7, %v37_v7  ;;  %v60_v18 = vld [vmem:[%s1504_s0 + $0x40] sm:$0xff]  ;;  %v61_v19 = vld [vmem:[%s1504_s0 + $0x48] sm:$0xff]  ;;  %v62_v20 = vld [vmem:[%s1504_s0 + $0x50] sm:$0xff]  ;;  %v198_v21 = vadd.f32 %v58_v13, %v56_v10  ;;  %v205_v22 = vadd.f32 %v59_v14, %v57_v12 }
   0x6   :  { %v63_v24 = vld [vmem:[%s1504_s0 + $0x58] sm:$0xff]  ;;  %v64_v25 = vld [vmem:[%s1504_s0 + $0x60] sm:$0xff]  ;;  %v65_v26 = vld [vmem:[%s1504_s0 + $0x68] sm:$0xff]  ;;  %v185_v27 = vrot.slane %v184_v15, 4  ;;  %v192_v28 = vrot.slane %v191_v16, 4  ;;  %v212_v29 = vadd.f32 %v62_v20, %v60_v18 }
   0x7   :  { %v41_v23 = vsel %vm40_vm0, %v38_v11, 0.0  ;;  %v44_v30 = vsel %vm40_vm0, %v39_v17, 0.0  ;;  %v66_v31 = vld [vmem:[%s1504_s0 + $0x70] sm:$0xff]  ;;  %v67_v32 = vld [vmem:[%s1504_s0 + $0x78] sm:$0xff]  ;;  %v199_v33 = vrot.slane %v198_v21, 4  ;;  %v206_v34 = vrot.slane %v205_v22, 4 }
   0x8   :  { %42 = vadd.xlane.f32.xlu0 %v41_v23  ;;  %v219_v35 = vadd.f32 %v63_v24, %v61_v19  ;;  %v186_v36 = vadd.f32 %v185_v27, %v184_v15  ;;  %v193_v37 = vadd.f32 %v192_v28, %v191_v16  ;;  %v213_v38 = vrot.slane %v212_v29, 4  ;;  %v68_v60 = vld [vmem:[%s1504_s0 + $0x80] sm:$0xff]  ;;  %v69_v61 = vld [vmem:[%s1504_s0 + $0x88] sm:$0xff]  ;;  %v70_v2 = vld [vmem:[%s1504_s0 + $0x90] sm:$0xff] }
   0x9   :  { %v226_v39 = vadd.f32 %v66_v31, %v64_v25  ;;  %v200_v40 = vadd.f32 %v199_v33, %v198_v21  ;;  %v207_v41 = vadd.f32 %v206_v34, %v205_v22  ;;  %v233_v43 = vadd.f32 %v67_v32, %v65_v26  ;;  %v71_v3 = vld [vmem:[%s1504_s0 + $0x98] sm:$0xff]  ;;  %v72_v4 = vld [vmem:[%s1504_s0 + $0xa0] sm:$0xff]  ;;  %v73_v9 = vld [vmem:[%s1504_s0 + $0xa8] sm:$0xff] }
   0xa   :  { %v220_v42 = vrot.slane %v219_v35, 4  ;;  %v187_v44 = vrot.slane %v186_v36, 2  ;;  %v194_v45 = vrot.slane %v193_v37, 2  ;;  %v214_v46 = vadd.f32 %v213_v38, %v212_v29  ;;  %v74_v10 = vld [vmem:[%s1504_s0 + $0xb0] sm:$0xff]  ;;  %v75_v11 = vld [vmem:[%s1504_s0 + $0xb8] sm:$0xff]  ;;  %v76_v15 = vld [vmem:[%s1504_s0 + $0xc0] sm:$0xff] }
   0xb   :  { %v227_v47 = vrot.slane %v226_v39, 4  ;;  %v201_v48 = vrot.slane %v200_v40, 2  ;;  %v208_v49 = vrot.slane %v207_v41, 2  ;;  %v234_v51 = vrot.slane %v233_v43, 4  ;;  %v78_v16 = vld [vmem:[%s1504_s0 + $0xd0] sm:$0xff]  ;;  %v77_v21 = vld [vmem:[%s1504_s0 + $0xc8] sm:$0xff] }
   0xc   :  { %45 = vadd.xlane.f32.xlu0 %v44_v30  ;;  %v221_v50 = vadd.f32 %v220_v42, %v219_v35  ;;  %v188_v52 = vadd.f32 %v187_v44, %v186_v36  ;;  %v195_v53 = vadd.f32 %v194_v45, %v193_v37  ;;  %v215_v54 = vrot.slane %v214_v46, 2  ;;  %v79_v22 = vld [vmem:[%s1504_s0 + $0xd8] sm:$0xff]  ;;  %v80_v31 = vld [vmem:[%s1504_s0 + $0xe0] sm:$0xff]  ;;  %v81_v36 = vld [vmem:[%s1504_s0 + $0xe8] sm:$0xff] }
   0xd   :  { %v228_v55 = vadd.f32 %v227_v47, %v226_v39  ;;  %v202_v56 = vadd.f32 %v201_v48, %v200_v40  ;;  %v209_v57 = vadd.f32 %v208_v49, %v207_v41  ;;  %v235_v59 = vadd.f32 %v234_v51, %v233_v43  ;;  %v82_v37 = vld [vmem:[%s1504_s0 + $0xf0] sm:$0xff]  ;;  %v83_v38 = vld [vmem:[%s1504_s0 + $0xf8] sm:$0xff] }
   0xe   :  { %v222_v58 = vrot.slane %v221_v50, 2  ;;  %v189_v62 = vrot.slane %v188_v52, 1  ;;  %v196_v63 = vrot.slane %v195_v53, 1  ;;  %v216_v0 = vadd.f32 %v215_v54, %v214_v46 }
   0xf   :  { %v229_v1 = vrot.slane %v228_v55, 2  ;;  %v203_v5 = vrot.slane %v202_v56, 1  ;;  %v210_v6 = vrot.slane %v209_v57, 1  ;;  %v236_v8 = vrot.slane %v235_v59, 2 }
  0x10   :  { %v223_v7 = vadd.f32 %v222_v58, %v221_v50  ;;  %v948_v12 = vadd.f32 %v189_v62, %v188_v52  ;;  %v217_v13 = vrot.slane %v216_v0, 1  ;;  %v956_v17 = vadd.f32 %v196_v63, %v195_v53 }
  0x11   :  { %v230_v14 = vadd.f32 %v229_v1, %v228_v55  ;;  %v958_v18 = vadd.f32 %v203_v5, %v202_v56  ;;  %v237_v20 = vadd.f32 %v236_v8, %v235_v59  ;;  %v966_v23 = vadd.f32 %v210_v6, %v209_v57  ;;  %v86_v8 = vld [vmem:[%s1504_s0 + $0x110] sm:$0xff] }
  0x12   :  { %v224_v19 = vrot.slane %v223_v7, 1  ;;  %v240_v25 = vadd.f32 %v70_v2, %v68_v60  ;;  %v247_v26 = vadd.f32 %v71_v3, %v69_v61  ;;  %v968_v27 = vadd.f32 %v217_v13, %v216_v0  ;;  %v84_v2 = vld [vmem:[%s1504_s0 + $0x100] sm:$0xff]  ;;  %v85_v3 = vld [vmem:[%s1504_s0 + $0x108] sm:$0xff] }
  0x13   :  { %v231_v24 = vrot.slane %v230_v14, 1  ;;  %v238_v28 = vrot.slane %v237_v20, 1  ;;  %v254_v29 = vadd.f32 %v74_v10, %v72_v4  ;;  %v261_v30 = vadd.f32 %v75_v11, %v73_v9  ;;  %v87_v9 = vld [vmem:[%s1504_s0 + $0x118] sm:$0xff]  ;;  %v88_v10 = vld [vmem:[%s1504_s0 + $0x120] sm:$0xff] }
  0x14   :  { %v973_v32 = vadd.f32 %v224_v19, %v223_v7  ;;  %v241_v33 = vrot.slane %v240_v25, 4  ;;  %v248_v34 = vrot.slane %v247_v26, 4  ;;  %v268_v35 = vadd.f32 %v78_v16, %v76_v15  ;;  %v89_v16 = vld [vmem:[%s1504_s0 + $0x128] sm:$0xff]  ;;  %v90_v19 = vld [vmem:[%s1504_s0 + $0x130] sm:$0xff] }
  0x15   :  { %v984_v39 = vadd.f32 %v231_v24, %v230_v14  ;;  %v255_v40 = vrot.slane %v254_v29, 4  ;;  %v262_v41 = vrot.slane %v261_v30, 4  ;;  %v275_v42 = vadd.f32 %v79_v22, %v77_v21 }
  0x16   :  { %v986_v43 = vadd.f32 %v238_v28, %v237_v20  ;;  %v242_v44 = vadd.f32 %v241_v33, %v240_v25  ;;  %v249_v45 = vadd.f32 %v248_v34, %v247_v26  ;;  %v269_v48 = vrot.slane %v268_v35, 4  ;;  %v91_v20 = vld [vmem:[%s1504_s0 + $0x138] sm:$0xff]  ;;  %v92_v26 = vld [vmem:[%s1504_s0 + $0x140] sm:$0xff]  ;;  %v94_v28 = vld [vmem:[%s1504_s0 + $0x150] sm:$0xff] }
  0x17   :  { %v256_v46 = vadd.f32 %v255_v40, %v254_v29  ;;  %v263_v47 = vadd.f32 %v262_v41, %v261_v30  ;;  %v276_v49 = vrot.slane %v275_v42, 4  ;;  %v282_v52 = vadd.f32 %v82_v37, %v80_v31  ;;  %v93_v34 = vld [vmem:[%s1504_s0 + $0x148] sm:$0xff] }
  0x18   :  { %v243_v50 = vrot.slane %v242_v44, 2  ;;  %v250_v51 = vrot.slane %v249_v45, 2  ;;  %v289_v53 = vadd.f32 %v83_v38, %v81_v36  ;;  %v270_v56 = vadd.f32 %v269_v48, %v268_v35  ;;  %v95_v35 = vld [vmem:[%s1504_s0 + $0x158] sm:$0xff] }
  0x19   :  { %v257_v54 = vrot.slane %v256_v46, 2  ;;  %v264_v55 = vrot.slane %v263_v47, 2  ;;  %v277_v57 = vadd.f32 %v276_v49, %v275_v42  ;;  %v283_v60 = vrot.slane %v282_v52, 4 }
  0x1a   :  { %v244_v58 = vadd.f32 %v243_v50, %v242_v44  ;;  %v251_v59 = vadd.f32 %v250_v51, %v249_v45  ;;  %v290_v61 = vrot.slane %v289_v53, 4  ;;  %v271_v0 = vrot.slane %v270_v56, 2  ;;  %v97_v51 = vld [vmem:[%s1504_s0 + $0x168] sm:$0xff] }
  0x1b   :  { %v258_v62 = vadd.f32 %v257_v54, %v256_v46  ;;  %v265_v63 = vadd.f32 %v264_v55, %v263_v47  ;;  %v278_v1 = vrot.slane %v277_v57, 2  ;;  %v284_v6 = vadd.f32 %v283_v60, %v282_v52  ;;  %v96_v46 = vld [vmem:[%s1504_s0 + $0x160] sm:$0xff]  ;;  %v98_v52 = vld [vmem:[%s1504_s0 + $0x170] sm:$0xff] }
  0x1c   :  { %v245_v4 = vrot.slane %v244_v58, 1  ;;  %v252_v5 = vrot.slane %v251_v59, 1  ;;  %v291_v7 = vadd.f32 %v290_v61, %v289_v53  ;;  %v272_v14 = vadd.f32 %v271_v0, %v270_v56  ;;  %v99_v53 = vld [vmem:[%s1504_s0 + $0x178] sm:$0xff] }
  0x1d   :  { %v259_v11 = vrot.slane %v258_v62, 1  ;;  %v266_v13 = vrot.slane %v265_v63, 1  ;;  %v279_v15 = vadd.f32 %v278_v1, %v277_v57  ;;  %v285_v24 = vrot.slane %v284_v6, 2 }
  0x1e   :  { %v1012_v21 = vadd.f32 %v245_v4, %v244_v58  ;;  %v1014_v22 = vadd.f32 %v252_v5, %v251_v59  ;;  %v292_v25 = vrot.slane %v291_v7, 2  ;;  %v273_v31 = vrot.slane %v272_v14, 1 }
  0x1f   :  { %v1022_v29 = vadd.f32 %v259_v11, %v258_v62  ;;  %v1024_v30 = vadd.f32 %v266_v13, %v265_v63  ;;  %v280_v33 = vrot.slane %v279_v15, 1  ;;  %v286_v36 = vadd.f32 %v285_v24, %v284_v6  ;;  %v100_v24 = vld [vmem:[%s1504_s0 + $0x180] sm:$0xff] }
  0x20   :  { %v293_v37 = vadd.f32 %v292_v25, %v291_v7  ;;  %v296_v38 = vadd.f32 %v86_v8, %v84_v2  ;;  %v303_v40 = vadd.f32 %v87_v9, %v85_v3  ;;  %v1032_v41 = vadd.f32 %v273_v31, %v272_v14  ;;  %v101_v25 = vld [vmem:[%s1504_s0 + $0x188] sm:$0xff] }
  0x21   :  { %v1034_v42 = vadd.f32 %v280_v33, %v279_v15  ;;  %v310_v44 = vadd.f32 %v90_v19, %v88_v10  ;;  %v317_v45 = vadd.f32 %v91_v20, %v89_v16  ;;  %v287_v47 = vrot.slane %v286_v36, 1 }
  0x22   :  { %v294_v48 = vrot.slane %v293_v37, 1  ;;  %v297_v49 = vrot.slane %v296_v38, 4  ;;  %v324_v50 = vadd.f32 %v94_v28, %v92_v26  ;;  %v304_v54 = vrot.slane %v303_v40, 4 }
  0x23   :  { %v311_v55 = vrot.slane %v310_v44, 4  ;;  %v318_v56 = vrot.slane %v317_v45, 4  ;;  %v331_v57 = vadd.f32 %v95_v35, %v93_v34  ;;  %v1048_v58 = vadd.f32 %v287_v47, %v286_v36  ;;  %v102_v34 = vld [vmem:[%s1504_s0 + $0x190] sm:$0xff]  ;;  %v103_v35 = vld [vmem:[%s1504_s0 + $0x198] sm:$0xff]  ;;  %v104_v36 = vld [vmem:[%s1504_s0 + $0x1a0] sm:$0xff] }
  0x24   :  { %v1050_v59 = vadd.f32 %v294_v48, %v293_v37  ;;  %v298_v60 = vadd.f32 %v297_v49, %v296_v38  ;;  %v325_v61 = vrot.slane %v324_v50, 4  ;;  %v305_v62 = vadd.f32 %v304_v54, %v303_v40  ;;  %v107_v47 = vld [vmem:[%s1504_s0 + $0x1b8] sm:$0xff] }
  0x25   :  { %v312_v63 = vadd.f32 %v311_v55, %v310_v44  ;;  %v319_v0 = vadd.f32 %v318_v56, %v317_v45  ;;  %v332_v1 = vrot.slane %v331_v57, 4  ;;  %v338_v4 = vadd.f32 %v98_v52, %v96_v46  ;;  %v105_v45 = vld [vmem:[%s1504_s0 + $0x1a8] sm:$0xff]  ;;  %v106_v46 = vld [vmem:[%s1504_s0 + $0x1b0] sm:$0xff]  ;;  %v108_v52 = vld [vmem:[%s1504_s0 + $0x1c0] sm:$0xff] }
  0x26   :  { %v299_v2 = vrot.slane %v298_v60, 2  ;;  %v326_v3 = vadd.f32 %v325_v61, %v324_v50  ;;  %v345_v5 = vadd.f32 %v99_v53, %v97_v51  ;;  %v306_v6 = vrot.slane %v305_v62, 2  ;;  %v110_v53 = vld [vmem:[%s1504_s0 + $0x1d0] sm:$0xff]  ;;  %v111_v61 = vld [vmem:[%s1504_s0 + $0x1d8] sm:$0xff] }
  0x27   :  { %v313_v7 = vrot.slane %v312_v63, 2  ;;  %v320_v8 = vrot.slane %v319_v0, 2  ;;  %v333_v9 = vadd.f32 %v332_v1, %v331_v57  ;;  %v339_v13 = vrot.slane %v338_v4, 4 }
  0x28   :  { %v300_v10 = vadd.f32 %v299_v2, %v298_v60  ;;  %v327_v11 = vrot.slane %v326_v3, 2  ;;  %v346_v14 = vrot.slane %v345_v5, 4  ;;  %v307_v15 = vadd.f32 %v306_v6, %v305_v62  ;;  %v109_v60 = vld [vmem:[%s1504_s0 + $0x1c8] sm:$0xff]  ;;  %v112_v6 = vld [vmem:[%s1504_s0 + $0x1e0] sm:$0xff] }
  0x29   :  { %v314_v16 = vadd.f32 %v313_v7, %v312_v63  ;;  %v321_v19 = vadd.f32 %v320_v8, %v319_v0  ;;  %v334_v20 = vrot.slane %v333_v9, 2  ;;  %v340_v31 = vadd.f32 %v339_v13, %v338_v4  ;;  %v114_v13 = vld [vmem:[%s1504_s0 + $0x1f0] sm:$0xff] }
  0x2a   :  { %v301_v26 = vrot.slane %v300_v10, 1  ;;  %v328_v28 = vadd.f32 %v327_v11, %v326_v3  ;;  %v347_v33 = vadd.f32 %v346_v14, %v345_v5  ;;  %v308_v37 = vrot.slane %v307_v15, 1  ;;  %v113_v11 = vld [vmem:[%s1504_s0 + $0x1e8] sm:$0xff]  ;;  %v115_v14 = vld [vmem:[%s1504_s0 + $0x1f8] sm:$0xff] }
  0x2b   :  { %v315_v38 = vrot.slane %v314_v16, 1  ;;  %v322_v40 = vrot.slane %v321_v19, 1  ;;  %v335_v44 = vadd.f32 %v334_v20, %v333_v9  ;;  %v341_v50 = vrot.slane %v340_v31, 2 }
  0x2c   :  { %v1076_v48 = vadd.f32 %v301_v26, %v300_v10  ;;  %v329_v49 = vrot.slane %v328_v28, 1  ;;  %v348_v51 = vrot.slane %v347_v33, 2  ;;  %v1084_v54 = vadd.f32 %v308_v37, %v307_v15 }
  0x2d   :  { %v1086_v55 = vadd.f32 %v315_v38, %v314_v16  ;;  %v1088_v56 = vadd.f32 %v322_v40, %v321_v19  ;;  %v336_v57 = vrot.slane %v335_v44, 1  ;;  %v342_v63 = vadd.f32 %v341_v50, %v340_v31 }
  0x2e   :  { %v1096_v62 = vadd.f32 %v329_v49, %v328_v28  ;;  %v349_v0 = vadd.f32 %v348_v51, %v347_v33  ;;  %v352_v1 = vadd.f32 %v102_v34, %v100_v24  ;;  %v359_v3 = vadd.f32 %v103_v35, %v101_v25 }
  0x2f   :  { %v1098_v2 = vadd.f32 %v336_v57, %v335_v44  ;;  %v366_v4 = vadd.f32 %v106_v46, %v104_v36  ;;  %v373_v5 = vadd.f32 %v107_v47, %v105_v45  ;;  %v343_v7 = vrot.slane %v342_v63, 1 }
  0x30   :  { %v350_v8 = vrot.slane %v349_v0, 1  ;;  %v353_v9 = vrot.slane %v352_v1, 4  ;;  %v380_v10 = vadd.f32 %v110_v53, %v108_v52  ;;  %v360_v15 = vrot.slane %v359_v3, 4 }
  0x31   :  { %v367_v16 = vrot.slane %v366_v4, 4  ;;  %v374_v19 = vrot.slane %v373_v5, 4  ;;  %v387_v20 = vadd.f32 %v111_v61, %v109_v60  ;;  %v1112_v24 = vadd.f32 %v343_v7, %v342_v63 }
  0x32   :  { %v1114_v25 = vadd.f32 %v350_v8, %v349_v0  ;;  %v354_v26 = vadd.f32 %v353_v9, %v352_v1  ;;  %v381_v28 = vrot.slane %v380_v10, 4  ;;  %v361_v31 = vadd.f32 %v360_v15, %v359_v3 }
  0x33   :  { %v368_v33 = vadd.f32 %v367_v16, %v366_v4  ;;  %v375_v34 = vadd.f32 %v374_v19, %v373_v5  ;;  %v388_v35 = vrot.slane %v387_v20, 4  ;;  %v394_v38 = vadd.f32 %v114_v13, %v112_v6 }
  0x34   :  { %v355_v36 = vrot.slane %v354_v26, 2  ;;  %v382_v37 = vadd.f32 %v381_v28, %v380_v10  ;;  %v401_v40 = vadd.f32 %v115_v14, %v113_v11  ;;  %v362_v44 = vrot.slane %v361_v31, 2 }
  0x35   :  { %v369_v45 = vrot.slane %v368_v33, 2  ;;  %v376_v46 = vrot.slane %v375_v34, 2  ;;  %v389_v47 = vadd.f32 %v388_v35, %v387_v20  ;;  %v395_v51 = vrot.slane %v394_v38, 4 }
  0x36   :  { %v356_v49 = vadd.f32 %v355_v36, %v354_v26  ;;  %v383_v50 = vrot.slane %v382_v37, 2  ;;  %v402_v52 = vrot.slane %v401_v40, 4  ;;  %v363_v53 = vadd.f32 %v362_v44, %v361_v31 }
  0x37   :  { %v370_v57 = vadd.f32 %v369_v45, %v368_v33  ;;  %v377_v60 = vadd.f32 %v376_v46, %v375_v34  ;;  %v390_v61 = vrot.slane %v389_v47, 2  ;;  %v396_v1 = vadd.f32 %v395_v51, %v394_v38  ;;  %v121_v45 = vld [vmem:[%s1505_s1 + $0x28] sm:$0xff] }
  0x38   :  { %v357_v63 = vrot.slane %v356_v49, 1  ;;  %v384_v0 = vadd.f32 %v383_v50, %v382_v37  ;;  %v403_v3 = vadd.f32 %v402_v52, %v401_v40  ;;  %v364_v4 = vrot.slane %v363_v53, 1 }
  0x39   :  { %v371_v5 = vrot.slane %v370_v57, 1  ;;  %v378_v6 = vrot.slane %v377_v60, 1  ;;  %v391_v7 = vadd.f32 %v390_v61, %v389_v47  ;;  %v397_v10 = vrot.slane %v396_v1, 2  ;;  %v124_v47 = vld [vmem:[%s1505_s1 + $0x40] sm:$0xff] }
  0x3a   :  { %v358_v8 = vadd.f32 %v357_v63, %v356_v49  ;;  %v385_v9 = vrot.slane %v384_v0, 1  ;;  %v404_v11 = vrot.slane %v403_v3, 2  ;;  %v365_v13 = vadd.f32 %v364_v4, %v363_v53  ;;  %v125_v49 = vld [vmem:[%s1505_s1 + $0x48] sm:$0xff]  ;;  %v126_v53 = vld [vmem:[%s1505_s1 + $0x50] sm:$0xff]  ;;  %v131_v4 = vld [vmem:[%s1505_s1 + $0x78] sm:$0xff] }
  0x3b   :  { %v372_v14 = vadd.f32 %v371_v5, %v370_v57  ;;  %v379_v15 = vadd.f32 %v378_v6, %v377_v60  ;;  %v392_v16 = vrot.slane %v391_v7, 1  ;;  %v398_v20 = vadd.f32 %v397_v10, %v396_v1  ;;  %v127_v57 = vld [vmem:[%s1505_s1 + $0x58] sm:$0xff]  ;;  %v128_v60 = vld [vmem:[%s1505_s1 + $0x60] sm:$0xff]  ;;  %v129_v1 = vld [vmem:[%s1505_s1 + $0x68] sm:$0xff] }
  0x3c   :  { %v386_v19 = vadd.f32 %v385_v9, %v384_v0  ;;  %v405_v26 = vadd.f32 %v404_v11, %v403_v3  ;;  %v441_v31 = vsel %vm440_vm1, %v958_v18, %v948_v12  ;;  %v454_v12 = vsel %vm440_vm1, %v966_v23, %v956_v17  ;;  %v118_v17 = vld [vmem:[%s1505_s1 + $0x10] sm:$0xff] }
  0x3d   :  { %v393_v28 = vadd.f32 %v392_v16, %v391_v7  ;;  %v399_v33 = vrot.slane %v398_v20, 1  ;;  %v443_v35 = vsel %vm442_vm2, %v968_v27, %v441_v31  ;;  %v455_v27 = vsel %vm442_vm2, %v973_v32, %v454_v12  ;;  %v130_v3 = vld [vmem:[%s1505_s1 + $0x70] sm:$0xff] }
  0x3e   :  { %v406_v34 = vrot.slane %v405_v26, 1  ;;  %v445_v36 = vsel %vm444_vm3, %v984_v39, %v443_v35  ;;  %v461_v39 = vsel %vm440_vm1, %v1086_v55, %v1076_v48  ;;  %v468_v44 = vsel %vm440_vm1, %v1088_v56, %v1084_v54  ;;  %v117_v54 = vld [vmem:[%s1505_s1 + $0x8] sm:$0xff]  ;;  %v119_v55 = vld [vmem:[%s1505_s1 + $0x18] sm:$0xff] }
  0x3f   :  { %v400_v37 = vadd.f32 %v399_v33, %v398_v20  ;;  %v447_v40 = vsel %vm446_vm4, %v1012_v21, %v445_v36  ;;  %v116_v21 = vld [vmem:[%s1505_s1] sm:$0xff]  ;;  %v456_v32 = vsel %vm444_vm3, %v986_v43, %v455_v27  ;;  %v469_v48 = vsel %vm442_vm2, %v1098_v2, %v468_v44 }
  0x40   :  { %v407_v38 = vadd.f32 %v406_v34, %v405_v26  ;;  %v449_v18 = vsel %vm448_vm5, %v1022_v29, %v447_v40  ;;  %v462_v29 = vsel %vm442_vm2, %v1096_v62, %v461_v39  ;;  %v457_v43 = vsel %vm446_vm4, %v1014_v22, %v456_v32  ;;  %v120_v2 = vld [vmem:[%s1505_s1 + $0x20] sm:$0xff] }
  0x41   :  { %v451_v23 = vsel %vm450_vm6, %v1032_v41, %v449_v18  ;;  %v463_v56 = vsel %vm444_vm3, %v1112_v24, %v462_v29  ;;  %v470_v62 = vsel %vm444_vm3, %v1114_v25, %v469_v48  ;;  %v458_v22 = vsel %vm448_vm5, %v1024_v30, %v457_v43  ;;  %v123_v25 = vld [vmem:[%s1505_s1 + $0x38] sm:$0xff]  ;;  %v132_v29 = vld [vmem:[%s1505_s1 + $0x80] sm:$0xff]  ;;  %v134_v48 = vld [vmem:[%s1505_s1 + $0x90] sm:$0xff] }
  0x42   :  { %v1160_v41 = vsel %vm452_vm7, %v1048_v58, %v451_v23  ;;  %v122_v58 = vld [vmem:[%s1505_s1 + $0x30] sm:$0xff]  ;;  %v464_v24 = vsel %vm446_vm4, %v358_v8, %v463_v56  ;;  %v471_v46 = vsel %vm446_vm4, %v365_v13, %v470_v62  ;;  %v459_v50 = vsel %vm450_vm6, %v1034_v42, %v458_v22  ;;  %v133_v62 = vld [vmem:[%s1505_s1 + $0x88] sm:$0xff] }
  0x43   :  { %v465_v30 = vsel %vm448_vm5, %v372_v14, %v464_v24  ;;  %v472_v51 = vsel %vm448_vm5, %v379_v15, %v471_v46  ;;  %v491_v52 = vadd.f32 %v118_v17, %v116_v21  ;;  %v1205_v42 = vsel %vm452_vm7, %v1050_v59, %v459_v50  ;;  %v136_v46 = vld [vmem:[%s1505_s1 + $0xa0] sm:$0xff] }
  0x44   :  { %v466_v61 = vsel %vm450_vm6, %v386_v19, %v465_v30  ;;  %v473_v63 = vsel %vm450_vm6, %v393_v28, %v472_v51  ;;  %v498_v0 = vadd.f32 %v119_v55, %v117_v54  ;;  %v505_v8 = vadd.f32 %v122_v58, %v120_v2  ;;  %v135_v2 = vld [vmem:[%s1505_s1 + $0x98] sm:$0xff] }
  0x45   :  { %v1219_v59 = vsel %vm452_vm7, %v400_v37, %v466_v61  ;;  %v1222_v5 = vsel %vm452_vm7, %v407_v38, %v473_v63  ;;  %v492_v6 = vrot.slane %v491_v52, 4  ;;  %v512_v10 = vadd.f32 %v123_v25, %v121_v45  ;;  %v137_v25 = vld [vmem:[%s1505_s1 + $0xa8] sm:$0xff] }
  0x46   :  { %v499_v7 = vrot.slane %v498_v0, 4  ;;  %v519_v11 = vadd.f32 %v126_v53, %v124_v47  ;;  %v526_v13 = vadd.f32 %v127_v57, %v125_v49  ;;  %v506_v15 = vrot.slane %v505_v8, 4  ;;  %v138_v47 = vld [vmem:[%s1505_s1 + $0xb0] sm:$0xff]  ;;  %v140_v53 = vld [vmem:[%s1505_s1 + $0xc0] sm:$0xff]  ;;  %v141_v57 = vld [vmem:[%s1505_s1 + $0xc8] sm:$0xff] }
  0x47   :  { %v493_v9 = vadd.f32 %v492_v6, %v491_v52  ;;  %v533_v16 = vadd.f32 %v130_v3, %v128_v60  ;;  %v540_v19 = vadd.f32 %v131_v4, %v129_v1  ;;  %v513_v26 = vrot.slane %v512_v10, 4  ;;  %v139_v52 = vld [vmem:[%s1505_s1 + $0xb8] sm:$0xff]  ;;  %v142_v1 = vld [vmem:[%s1505_s1 + $0xd0] sm:$0xff]  ;;  %v144_v4 = vld [vmem:[%s1505_s1 + $0xe0] sm:$0xff] }
  0x48   :  { %v500_v14 = vadd.f32 %v499_v7, %v498_v0  ;;  %v520_v28 = vrot.slane %v519_v11, 4  ;;  %v527_v31 = vrot.slane %v526_v13, 4  ;;  %v507_v34 = vadd.f32 %v506_v15, %v505_v8  ;;  %v143_v3 = vld [vmem:[%s1505_s1 + $0xd8] sm:$0xff] }
  0x49   :  { %v494_v20 = vrot.slane %v493_v9, 2  ;;  %v534_v35 = vrot.slane %v533_v16, 4  ;;  %v541_v36 = vrot.slane %v540_v19, 4  ;;  %v514_v38 = vadd.f32 %v513_v26, %v512_v10  ;;  %v145_v10 = vld [vmem:[%s1505_s1 + $0xe8] sm:$0xff] }
  0x4a   :  { %v501_v33 = vrot.slane %v500_v14, 2  ;;  %v521_v40 = vadd.f32 %v520_v28, %v519_v11  ;;  %v528_v12 = vadd.f32 %v527_v31, %v526_v13  ;;  %v508_v27 = vrot.slane %v507_v34, 2  ;;  %v146_v11 = vld [vmem:[%s1505_s1 + $0xf0] sm:$0xff]  ;;  %v147_v13 = vld [vmem:[%s1505_s1 + $0xf8] sm:$0xff] }
  0x4b   :  { %v495_v37 = vadd.f32 %v494_v20, %v493_v9  ;;  %v535_v39 = vadd.f32 %v534_v35, %v533_v16  ;;  %v542_v44 = vadd.f32 %v541_v36, %v540_v19  ;;  %v515_v17 = vrot.slane %v514_v38, 2 }
  0x4c   :  { %v502_v18 = vadd.f32 %v501_v33, %v500_v14  ;;  %v522_v23 = vrot.slane %v521_v40, 2  ;;  %v529_v32 = vrot.slane %v528_v12, 2  ;;  %v509_v55 = vadd.f32 %v508_v27, %v507_v34 }
  0x4d   :  { %v496_v21 = vrot.slane %v495_v37, 1  ;;  %v536_v43 = vrot.slane %v535_v39, 2  ;;  %v543_v56 = vrot.slane %v542_v44, 2  ;;  %v516_v58 = vadd.f32 %v515_v17, %v514_v38 }
  0x4e   :  { %v503_v54 = vrot.slane %v502_v18, 1  ;;  %v523_v22 = vadd.f32 %v522_v23, %v521_v40  ;;  %v530_v24 = vadd.f32 %v529_v32, %v528_v12  ;;  %v510_v50 = vrot.slane %v509_v55, 1 }
  0x4f   :  { %v1236_v45 = vadd.f32 %v496_v21, %v495_v37  ;;  %v537_v30 = vadd.f32 %v536_v43, %v535_v39  ;;  %v544_v51 = vadd.f32 %v543_v56, %v542_v44  ;;  %v517_v60 = vrot.slane %v516_v58, 1 }
  0x50   :  { %v1247_v49 = vadd.f32 %v503_v54, %v502_v18  ;;  %v524_v61 = vrot.slane %v523_v22, 1  ;;  %v531_v63 = vrot.slane %v530_v24, 1  ;;  %v547_v0 = vadd.f32 %v134_v48, %v132_v29 }
  0x51   :  { %v1267_v6 = vadd.f32 %v510_v50, %v509_v55  ;;  %v538_v7 = vrot.slane %v537_v30, 1  ;;  %v545_v8 = vrot.slane %v544_v51, 1  ;;  %v554_v9 = vadd.f32 %v135_v2, %v133_v62 }
  0x52   :  { %v1278_v14 = vadd.f32 %v517_v60, %v516_v58  ;;  %v1280_v15 = vadd.f32 %v524_v61, %v523_v22  ;;  %v1282_v16 = vadd.f32 %v531_v63, %v530_v24  ;;  %v548_v19 = vrot.slane %v547_v0, 4 }
  0x53   :  { %v1284_v20 = vadd.f32 %v538_v7, %v537_v30  ;;  %v1286_v26 = vadd.f32 %v545_v8, %v544_v51  ;;  %v555_v28 = vrot.slane %v554_v9, 4  ;;  %v561_v31 = vadd.f32 %v138_v47, %v136_v46  ;;  %v150_v47 = vld [vmem:[%s1505_s1 + $0x110] sm:$0xff] }
  0x54   :  { %v549_v33 = vadd.f32 %v548_v19, %v547_v0  ;;  %v568_v34 = vadd.f32 %v139_v52, %v137_v25  ;;  %v575_v35 = vadd.f32 %v142_v1, %v140_v53  ;;  %v582_v36 = vadd.f32 %v143_v3, %v141_v57  ;;  %v148_v25 = vld [vmem:[%s1505_s1 + $0x100] sm:$0xff]  ;;  %v149_v53 = vld [vmem:[%s1505_s1 + $0x108] sm:$0xff]  ;;  %v151_v57 = vld [vmem:[%s1505_s1 + $0x118] sm:$0xff] }
  0x55   :  { %v556_v37 = vadd.f32 %v555_v28, %v554_v9  ;;  %v562_v38 = vrot.slane %v561_v31, 4  ;;  %v589_v40 = vadd.f32 %v146_v11, %v144_v4  ;;  %v596_v12 = vadd.f32 %v147_v13, %v145_v10  ;;  %v152_v1 = vld [vmem:[%s1505_s1 + $0x120] sm:$0xff]  ;;  %v153_v3 = vld [vmem:[%s1505_s1 + $0x128] sm:$0xff]  ;;  %v154_v4 = vld [vmem:[%s1505_s1 + $0x130] sm:$0xff] }
  0x56   :  { %v550_v18 = vrot.slane %v549_v33, 2  ;;  %v569_v27 = vrot.slane %v568_v34, 4  ;;  %v576_v39 = vrot.slane %v575_v35, 4  ;;  %v583_v44 = vrot.slane %v582_v36, 4  ;;  %v155_v11 = vld [vmem:[%s1505_s1 + $0x138] sm:$0xff]  ;;  %v156_v13 = vld [vmem:[%s1505_s1 + $0x140] sm:$0xff] }
  0x57   :  { %v557_v21 = vrot.slane %v556_v37, 2  ;;  %v563_v17 = vadd.f32 %v562_v38, %v561_v31  ;;  %v590_v23 = vrot.slane %v589_v40, 4  ;;  %v597_v32 = vrot.slane %v596_v12, 4  ;;  %v157_v19 = vld [vmem:[%s1505_s1 + $0x148] sm:$0xff] }
  0x58   :  { %v551_v29 = vadd.f32 %v550_v18, %v549_v33  ;;  %v570_v48 = vadd.f32 %v569_v27, %v568_v34  ;;  %v577_v54 = vadd.f32 %v576_v39, %v575_v35  ;;  %v584_v55 = vadd.f32 %v583_v44, %v582_v36  ;;  %v158_v35 = vld [vmem:[%s1505_s1 + $0x150] sm:$0xff]  ;;  %v159_v36 = vld [vmem:[%s1505_s1 + $0x158] sm:$0xff]  ;;  %v161_v27 = vld [vmem:[%s1505_s1 + $0x168] sm:$0xff] }
  0x59   :  { %v558_v43 = vadd.f32 %v557_v21, %v556_v37  ;;  %v564_v56 = vrot.slane %v563_v17, 2  ;;  %v591_v62 = vadd.f32 %v590_v23, %v589_v40  ;;  %v598_v2 = vadd.f32 %v597_v32, %v596_v12  ;;  %v160_v37 = vld [vmem:[%s1505_s1 + $0x160] sm:$0xff]  ;;  %v162_v39 = vld [vmem:[%s1505_s1 + $0x170] sm:$0xff]  ;;  %v163_v44 = vld [vmem:[%s1505_s1 + $0x178] sm:$0xff] }
  0x5a   :  { %v552_v58 = vrot.slane %v551_v29, 1  ;;  %v571_v22 = vrot.slane %v570_v48, 2  ;;  %v578_v24 = vrot.slane %v577_v54, 2  ;;  %v585_v46 = vrot.slane %v584_v55, 2 }
  0x5b   :  { %v559_v50 = vrot.slane %v558_v43, 1  ;;  %v565_v30 = vadd.f32 %v564_v56, %v563_v17  ;;  %v592_v51 = vrot.slane %v591_v62, 2  ;;  %v599_v52 = vrot.slane %v598_v2, 2 }
  0x5c   :  { %v1300_v60 = vadd.f32 %v552_v58, %v551_v29  ;;  %v572_v61 = vadd.f32 %v571_v22, %v570_v48  ;;  %v579_v63 = vadd.f32 %v578_v24, %v577_v54  ;;  %v586_v0 = vadd.f32 %v585_v46, %v584_v55 }
  0x5d   :  { %v1311_v7 = vadd.f32 %v559_v50, %v558_v43  ;;  %v566_v8 = vrot.slane %v565_v30, 1  ;;  %v593_v9 = vadd.f32 %v592_v51, %v591_v62  ;;  %v600_v10 = vadd.f32 %v599_v52, %v598_v2 }
  0x5e   :  { %v573_v28 = vrot.slane %v572_v61, 1  ;;  %v580_v31 = vrot.slane %v579_v63, 1  ;;  %v587_v33 = vrot.slane %v586_v0, 1  ;;  %v603_v34 = vadd.f32 %v150_v47, %v148_v25 }
  0x5f   :  { %v1331_v38 = vadd.f32 %v566_v8, %v565_v30  ;;  %v594_v40 = vrot.slane %v593_v9, 1  ;;  %v601_v12 = vrot.slane %v600_v10, 1  ;;  %v610_v18 = vadd.f32 %v151_v57, %v149_v53 }
  0x60   :  { %v1342_v21 = vadd.f32 %v573_v28, %v572_v61  ;;  %v1344_v17 = vadd.f32 %v580_v31, %v579_v63  ;;  %v1346_v23 = vadd.f32 %v587_v33, %v586_v0  ;;  %v604_v32 = vrot.slane %v603_v34, 4  ;;  %v164_v28 = vld [vmem:[%s1505_s1 + $0x180] sm:$0xff]  ;;  %v166_v31 = vld [vmem:[%s1505_s1 + $0x190] sm:$0xff] }
  0x61   :  { %v1348_v29 = vadd.f32 %v594_v40, %v593_v9  ;;  %v1350_v48 = vadd.f32 %v601_v12, %v600_v10  ;;  %v611_v54 = vrot.slane %v610_v18, 4  ;;  %v617_v55 = vadd.f32 %v154_v4, %v152_v1  ;;  %v167_v40 = vld [vmem:[%s1505_s1 + $0x198] sm:$0xff] }
  0x62   :  { %v605_v43 = vadd.f32 %v604_v32, %v603_v34  ;;  %v624_v56 = vadd.f32 %v155_v11, %v153_v3  ;;  %v631_v62 = vadd.f32 %v158_v35, %v156_v13  ;;  %v638_v2 = vadd.f32 %v159_v36, %v157_v19  ;;  %v169_v32 = vld [vmem:[%s1505_s1 + $0x1a8] sm:$0xff] }
  0x63   :  { %v612_v58 = vadd.f32 %v611_v54, %v610_v18  ;;  %v618_v22 = vrot.slane %v617_v55, 4  ;;  %v645_v24 = vadd.f32 %v162_v39, %v160_v37  ;;  %v652_v46 = vadd.f32 %v163_v44, %v161_v27  ;;  %v165_v37 = vld [vmem:[%s1505_s1 + $0x188] sm:$0xff]  ;;  %v168_v44 = vld [vmem:[%s1505_s1 + $0x1a0] sm:$0xff]  ;;  %v170_v54 = vld [vmem:[%s1505_s1 + $0x1b0] sm:$0xff] }
  0x64   :  { %v606_v25 = vrot.slane %v605_v43, 2  ;;  %v625_v47 = vrot.slane %v624_v56, 4  ;;  %v632_v50 = vrot.slane %v631_v62, 4  ;;  %v639_v30 = vrot.slane %v638_v2, 4 }
  0x65   :  { %v613_v51 = vrot.slane %v612_v58, 2  ;;  %v619_v52 = vadd.f32 %v618_v22, %v617_v55  ;;  %v646_v53 = vrot.slane %v645_v24, 4  ;;  %v653_v57 = vrot.slane %v652_v46, 4  ;;  %v173_v22 = vld [vmem:[%s1505_s1 + $0x1c8] sm:$0xff] }
  0x66   :  { %v607_v61 = vadd.f32 %v606_v25, %v605_v43  ;;  %v626_v63 = vadd.f32 %v625_v47, %v624_v56  ;;  %v633_v0 = vadd.f32 %v632_v50, %v631_v62  ;;  %v640_v1 = vadd.f32 %v639_v30, %v638_v2  ;;  %v171_v2 = vld [vmem:[%s1505_s1 + $0x1b8] sm:$0xff]  ;;  %v174_v50 = vld [vmem:[%s1505_s1 + $0x1d0] sm:$0xff] }
  0x67   :  { %v614_v4 = vadd.f32 %v613_v51, %v612_v58  ;;  %v620_v3 = vrot.slane %v619_v52, 2  ;;  %v647_v8 = vadd.f32 %v646_v53, %v645_v24  ;;  %v654_v9 = vadd.f32 %v653_v57, %v652_v46  ;;  %v172_v58 = vld [vmem:[%s1505_s1 + $0x1c0] sm:$0xff]  ;;  %v175_v30 = vld [vmem:[%s1505_s1 + $0x1d8] sm:$0xff] }
  0x68   :  { %v608_v10 = vrot.slane %v607_v61, 1  ;;  %v627_v11 = vrot.slane %v626_v63, 2  ;;  %v634_v13 = vrot.slane %v633_v0, 2  ;;  %v641_v19 = vrot.slane %v640_v1, 2  ;;  %v176_v51 = vld [vmem:[%s1505_s1 + $0x1e0] sm:$0xff] }
  0x69   :  { %v615_v33 = vrot.slane %v614_v4, 1  ;;  %v621_v34 = vadd.f32 %v620_v3, %v619_v52  ;;  %v648_v35 = vrot.slane %v647_v8, 2  ;;  %v655_v36 = vrot.slane %v654_v9, 2 }
  0x6a   :  { %v1364_v12 = vadd.f32 %v608_v10, %v607_v61  ;;  %v628_v18 = vadd.f32 %v627_v11, %v626_v63  ;;  %v635_v27 = vadd.f32 %v634_v13, %v633_v0  ;;  %v642_v39 = vadd.f32 %v641_v19, %v640_v1  ;;  %v177_v63 = vld [vmem:[%s1505_s1 + $0x1e8] sm:$0xff]  ;;  %v178_v0 = vld [vmem:[%s1505_s1 + $0x1f0] sm:$0xff]  ;;  %v179_v1 = vld [vmem:[%s1505_s1 + $0x1f8] sm:$0xff] }
  0x6b   :  { %v1375_v55 = vadd.f32 %v615_v33, %v614_v4  ;;  %v622_v43 = vrot.slane %v621_v34, 1  ;;  %v649_v56 = vadd.f32 %v648_v35, %v647_v8  ;;  %v656_v62 = vadd.f32 %v655_v36, %v654_v9 }
  0x6c   :  { %v629_v24 = vrot.slane %v628_v18, 1  ;;  %v636_v46 = vrot.slane %v635_v27, 1  ;;  %v643_v25 = vrot.slane %v642_v39, 1  ;;  %v659_v47 = vadd.f32 %v166_v31, %v164_v28 }
  0x6d   :  { %v1395_v52 = vadd.f32 %v622_v43, %v621_v34  ;;  %v650_v53 = vrot.slane %v649_v56, 1  ;;  %v657_v57 = vrot.slane %v656_v62, 1  ;;  %v666_v61 = vadd.f32 %v167_v40, %v165_v37 }
  0x6e   :  { %v1406_v4 = vadd.f32 %v629_v24, %v628_v18  ;;  %v1408_v3 = vadd.f32 %v636_v46, %v635_v27  ;;  %v1410_v8 = vadd.f32 %v643_v25, %v642_v39  ;;  %v660_v9 = vrot.slane %v659_v47, 4 }
  0x6f   :  { %v1412_v10 = vadd.f32 %v650_v53, %v649_v56  ;;  %v1414_v11 = vadd.f32 %v657_v57, %v656_v62  ;;  %v667_v13 = vrot.slane %v666_v61, 4  ;;  %v673_v19 = vadd.f32 %v170_v54, %v168_v44 }
  0x70   :  { %v661_v28 = vadd.f32 %v660_v9, %v659_v47  ;;  %v680_v31 = vadd.f32 %v171_v2, %v169_v32  ;;  %v687_v33 = vadd.f32 %v174_v50, %v172_v58  ;;  %v694_v34 = vadd.f32 %v175_v30, %v173_v22 }
  0x71   :  { %v668_v35 = vadd.f32 %v667_v13, %v666_v61  ;;  %v674_v36 = vrot.slane %v673_v19, 4  ;;  %v701_v37 = vadd.f32 %v178_v0, %v176_v51  ;;  %v708_v40 = vadd.f32 %v179_v1, %v177_v63 }
  0x72   :  { %v662_v18 = vrot.slane %v661_v28, 2  ;;  %v681_v27 = vrot.slane %v680_v31, 4  ;;  %v688_v43 = vrot.slane %v687_v33, 4  ;;  %v695_v39 = vrot.slane %v694_v34, 4 }
  0x73   :  { %v669_v24 = vrot.slane %v668_v35, 2  ;;  %v675_v46 = vadd.f32 %v674_v36, %v673_v19  ;;  %v702_v56 = vrot.slane %v701_v37, 4  ;;  %v709_v25 = vrot.slane %v708_v40, 4 }
  0x74   :  { %v663_v62 = vadd.f32 %v662_v18, %v661_v28  ;;  %v682_v53 = vadd.f32 %v681_v27, %v680_v31  ;;  %v689_v57 = vadd.f32 %v688_v43, %v687_v33  ;;  %v696_v44 = vadd.f32 %v695_v39, %v694_v34 }
  0x75   :  { %v670_v54 = vadd.f32 %v669_v24, %v668_v35  ;;  %v676_v32 = vrot.slane %v675_v46, 2  ;;  %v703_v2 = vadd.f32 %v702_v56, %v701_v37  ;;  %v710_v58 = vadd.f32 %v709_v25, %v708_v40 }
  0x76   :  { %v664_v22 = vrot.slane %v663_v62, 1  ;;  %v683_v47 = vrot.slane %v682_v53, 2  ;;  %v690_v50 = vrot.slane %v689_v57, 2  ;;  %v697_v30 = vrot.slane %v696_v44, 2 }
  0x77   :  { %v671_v51 = vrot.slane %v670_v54, 1  ;;  %v677_v61 = vadd.f32 %v676_v32, %v675_v46  ;;  %v704_v63 = vrot.slane %v703_v2, 2  ;;  %v711_v0 = vrot.slane %v710_v58, 2 }
  0x78   :  { %v665_v1 = vadd.f32 %v664_v22, %v663_v62  ;;  %v684_v9 = vadd.f32 %v683_v47, %v682_v53  ;;  %v691_v13 = vadd.f32 %v690_v50, %v689_v57  ;;  %v698_v19 = vadd.f32 %v697_v30, %v696_v44 }
  0x79   :  { %v672_v28 = vadd.f32 %v671_v51, %v670_v54  ;;  %v678_v31 = vrot.slane %v677_v61, 1  ;;  %v705_v33 = vadd.f32 %v704_v63, %v703_v2  ;;  %v712_v34 = vadd.f32 %v711_v0, %v710_v58 }
  0x7a   :  { %v685_v35 = vrot.slane %v684_v9, 1  ;;  %v692_v36 = vrot.slane %v691_v13, 1  ;;  %v699_v37 = vrot.slane %v698_v19, 1  ;;  %v747_v40 = vsel %vm440_vm1, %v1267_v6, %v1236_v45 }
  0x7b   :  { %v679_v18 = vadd.f32 %v678_v31, %v677_v61  ;;  %v706_v27 = vrot.slane %v705_v33, 1  ;;  %v713_v43 = vrot.slane %v712_v34, 1  ;;  %v748_v39 = vsel %vm442_vm2, %v1280_v15, %v747_v40 }
  0x7c   :  { %v686_v24 = vadd.f32 %v685_v35, %v684_v9  ;;  %v693_v46 = vadd.f32 %v692_v36, %v691_v13  ;;  %v700_v56 = vadd.f32 %v699_v37, %v698_v19  ;;  %v749_v25 = vsel %vm444_vm3, %v1284_v20, %v748_v39 }
  0x7d   :  { %v707_v62 = vadd.f32 %v706_v27, %v705_v33  ;;  %v714_v53 = vadd.f32 %v713_v43, %v712_v34  ;;  %v750_v57 = vsel %vm446_vm4, %v1300_v60, %v749_v25  ;;  %v754_v45 = vsel %vm440_vm1, %v1278_v14, %v1247_v49 }
  0x7e   :  { %v751_v6 = vsel %vm448_vm5, %v1331_v38, %v750_v57  ;;  %v755_v15 = vsel %vm442_vm2, %v1282_v16, %v754_v45  ;;  %v761_v44 = vsel %vm440_vm1, %v1395_v52, %v1364_v12  ;;  %v768_v20 = vsel %vm440_vm1, %v1406_v4, %v1375_v55 }
  0x7f   :  { %v752_v60 = vsel %vm450_vm6, %v1344_v17, %v751_v6  ;;  %v756_v49 = vsel %vm444_vm3, %v1286_v26, %v755_v15  ;;  %v762_v14 = vsel %vm442_vm2, %v1408_v3, %v761_v44  ;;  %v769_v16 = vsel %vm442_vm2, %v1410_v8, %v768_v20 }
  0x80   :  { %v753_v38 = vsel %vm452_vm7, %v1348_v29, %v752_v60  ;;  %v757_v12 = vsel %vm446_vm4, %v1311_v7, %v756_v49  ;;  %v763_v55 = vsel %vm444_vm3, %v1412_v10, %v762_v14  ;;  %v770_v17 = vsel %vm444_vm3, %v1414_v11, %v769_v16 }
  0x81   :  { %v758_v26 = vsel %vm448_vm5, %v1342_v21, %v757_v12  ;;  %v764_v52 = vsel %vm446_vm4, %v665_v1, %v763_v55  ;;  %v771_v4 = vsel %vm446_vm4, %v672_v28, %v770_v17  ;;  %v794_v8 = vmul.f32 0.0625, %v1160_v41 }
  0x82   :  { %v759_v3 = vsel %vm450_vm6, %v1346_v23, %v758_v26  ;;  %v765_v29 = vsel %vm448_vm5, %v679_v18, %v764_v52  ;;  %v772_v7 = vsel %vm448_vm5, %v686_v24, %v771_v4  ;;  %v795_v54 = vmul.f32 0.0625, %v1205_v42 }
  0x83   :  { %v760_v10 = vsel %vm452_vm7, %v1350_v48, %v759_v3  ;;  %v766_v11 = vsel %vm450_vm6, %v693_v46, %v765_v29  ;;  %v773_v21 = vsel %vm450_vm6, %v700_v56, %v772_v7  ;;  %v796_v23 = vmul.f32 0.0625, %v1219_v59  ;;  %798 = vst [vmem:[%s1506_s4] sm:$0xff] %v794_v8 }
  0x84   :  { %v767_v32 = vsel %vm452_vm7, %v707_v62, %v766_v11  ;;  %v774_v2 = vsel %vm452_vm7, %v714_v53, %v773_v21  ;;  %v797_v41 = vmul.f32 0.0625, %v1222_v5  ;;  %799 = vst [vmem:[%s1506_s4 + $0x8] sm:$0xff] %v795_v54  ;;  %v806_v48 = vmul.f32 0.0625, %v753_v38 }
  0x85   :  { %800 = vst [vmem:[%s1506_s4 + $0x10] sm:$0xff] %v796_v23  ;;  %v807_v42 = vmul.f32 0.0625, %v760_v10  ;;  %v808_v59 = vmul.f32 0.0625, %v767_v32  ;;  %v809_v58 = vmul.f32 0.0625, %v774_v2 }
  0x86   :  { %801 = vst [vmem:[%s1506_s4 + $0x18] sm:$0xff] %v797_v41  ;;  %810 = vst [vmem:[%s1507_s5] sm:$0xff] %v806_v48 }
  0x87   :  { %811 = vst [vmem:[%s1507_s5 + $0x8] sm:$0xff] %v807_v42  ;;  %812 = vst [vmem:[%s1507_s5 + $0x10] sm:$0xff] %v808_v59 }
  0x88   :  { %813 = vst [vmem:[%s1507_s5 + $0x18] sm:$0xff] %v809_v58 }
  0x95   :  { %v43_v5 = vpop.xlane.xlu0 %42 }
  0x96   :  { %v47_v22 = vmul.f32 0.03125, %v43_v5 }
  0x98   :  { %50 = vst.msk [vmem:[%s1508_s6] sm:$0xff] %vm49_vm8, %v47_v22 }
  0x99   :  { %v46_v47 = vpop.xlane.xlu0 %45 }
  0x9a   :  { %v48_v50 = vmul.f32 0.03125, %v46_v47 }
  0x9c   :  { %51 = vst.msk [vmem:[%s1508_s6 + $0x8] sm:$0xff] %vm49_vm8, %v48_v50 }

</bundles_post_ra>
